<compile_context>
chip_gen: v7x
topology: tpu7x:2x2x1
jax: 0.10.0
libtpu: 0.0.40
codegen_flags: <defaults>
</compile_context>

<pallas_src>
import jax
import jax.numpy as jnp
import numpy as np
from jax.experimental import pallas as pl
from jax.experimental.pallas import tpu as pltpu


# ----------------------------------------------------------------------------
# Pallas kernel: one grid step = one group of G images (stacked on sublanes) x
# one 128-multiple lane chunk of the flattened H*W axis.
# ----------------------------------------------------------------------------
def _diffusion_loss_kernel(x_ref, noise_ref,        # (1, GC, Pt) f32
                           coef_a_ref, coef_s_ref,  # (1, GC, 1)  f32
                           w1_aug_ref,              # (1, GH, 8+GC) f32 (bias col | 0 | block-diag w1)
                           w2_ref,                  # (GC, GH) f32 resident block-diag
                           b2_ref,                  # (GC, 1)  f32 resident
                           out_ref):                # (1, 1, 8, 128) f32 lane-dense partial SSE
    GC, Pt = x_ref.shape[1], x_ref.shape[2]

    xg = x_ref[0]                                    # (GC, Pt) f32
    ng = noise_ref[0]                                # (GC, Pt) f32 ground-truth noise

    # add_noise_x / q(x_t | x_0): per-image scalars sit on the sublane axis and
    # broadcast along lanes (full vregs, no scalar splat loop).
    noisy = coef_a_ref[0] * xg + coef_s_ref[0] * ng  # (GC, Pt) f32

    # Bias-in-matmul fold: prepend an aligned ones block; LHS column 0 carries the
    # per-image (time/class) bias, columns 1..7 are zero, columns 8.. are w1.
    aug = jnp.concatenate([jnp.ones((8, Pt), jnp.float32), noisy], axis=0)   # (8+GC, Pt)

    # Layer 1 (block-diag 1x1 conv + bias, out of the MXU already biased) + ReLU.
    h = jnp.dot(w1_aug_ref[0], aug, preferred_element_type=jnp.float32)      # (GH, Pt)
    h = jnp.maximum(h, 0.0)

    # Layer 2 (block-diag 1x1 conv): f32 h straight to the MXU (no bf16 pack pass).
    pred = jnp.dot(w2_ref[...], h, preferred_element_type=jnp.float32) + b2_ref[...]

    # l2_mse partials.
    diff = pred - ng
    sq = diff * diff                                 # (GC, Pt)

    # Lane fold to 128 lanes: tree of 128-aligned slice adds (pure VPU, short dep chain).
    chunks = [sq[:, k * 128:(k + 1) * 128] for k in range(Pt // 128)]
    while len(chunks) > 1:
        nxt = [chunks[a] + chunks[a + 1] for a in range(0, len(chunks) - 1, 2)]
        if len(chunks) % 2:
            nxt.append(chunks[-1])
        chunks = nxt
    folded = chunks[0]                               # (GC, 128)

    # Sublane fold / zero-pad to a full (8, 128) output tile (unmasked lane-dense store).
    if GC < 8:
        out8 = jnp.concatenate(
            [folded, jnp.zeros((8 - GC, 128), jnp.float32)], axis=0)
    else:
        out8 = folded[0:8, :]
        r = 8
        while r + 8 <= GC:
            out8 = out8 + folded[r:r + 8, :]
            r += 8
        if r < GC:
            out8 = out8 + jnp.concatenate(
                [folded[r:GC, :], jnp.zeros((8 - (GC - r), 128), jnp.float32)], axis=0)

    out_ref[...] = out8[None, None, :, :]


# ----------------------------------------------------------------------------
# Tiling heuristics.
# ----------------------------------------------------------------------------
def _choose_group(B, C, max_group=8):
    """Images per sublane-group: divisor of B, prefer (G*C)%8==0 and >=2 batch tiles."""
    divisors = [d for d in range(1, B + 1) if B % d == 0]
    aligned = [d for d in divisors if (d * C) % 8 == 0]
    cands = aligned if aligned else divisors
    multi = [d for d in cands if B // d >= 2]        # keep >=2 grid steps when possible (v7x: 2 TCs)
    pool = multi if multi else cands
    small = [d for d in pool if d <= max_group]
    pool = small if small else [min(pool)]
    return max(pool)


def _choose_lane_tile(GC, GH, P, n_batch_tiles, budget_bytes=16 << 20):
    """Lane-chunk size: 128-multiple divisor of P bounded by a VMEM live-value budget."""
    assert P % 128 == 0
    per_lane_f32 = 7 * GC + GH + 16                  # rough live footprint per lane column
    max_pt = (budget_bytes // (4 * per_lane_f32)) // 128 * 128
    max_pt = max(128, min(P, max_pt))
    pt = 128
    cand = 128
    while cand <= max_pt:
        if P % cand == 0:
            pt = cand
        cand += 128
    # Ensure >=2 total grid steps when the batch axis collapses to one tile (v7x).
    if n_batch_tiles == 1 and pt == P and P > 128:
        cand = (P // 2) // 128 * 128
        while cand >= 128:
            if P % cand == 0:
                pt = cand
                break
            cand -= 128
    return pt


# ----------------------------------------------------------------------------
# Wrapper: layout glue (free reshapes, per-batch gathers, block-diag weights)
# + pallas_call + final scalar reduction.
# ----------------------------------------------------------------------------
def diffusion_forward(params, x, tstep, noise, yclass=None,
                      *, group_images=None, lane_tile=None):
    """x: (B, C, H, W) f32 NCHW. Returns the scalar l2_mse diffusion loss."""
    B, C, H, W = x.shape
    P = H * W
    assert P % 128 == 0, "H*W must be a multiple of 128 (TPU lane width)"
    hidden = params["w1"].shape[0]
    f32 = jnp.float32

    G = group_images if group_images is not None else _choose_group(B, C)
    assert B % G == 0
    GC, GH = G * C, G * hidden
    num_tiles = B // G

    Pt = lane_tile if lane_tile is not None else _choose_lane_tile(GC, GH, P, num_tiles)
    assert P % Pt == 0 and Pt % 128 == 0
    n_lane = P // Pt

    # Contiguous, free reshapes — no dtype casts (no extra HBM pass).
    x3 = x.reshape(num_tiles, GC, P)
    n3 = noise.reshape(num_tiles, GC, P)
    if x3.dtype != f32:
        x3 = x3.astype(f32)
    if n3.dtype != f32:
        n3 = n3.astype(f32)

    # extract_noise_factor(buffer, t, shape): per-image scalar gathers expanded to
    # per-channel sublane columns.
    a_img = params["sqrt_alphas_bar"][tstep].astype(f32)             # (B,)
    s_img = params["sqrt_one_minus_alphas_bar"][tstep].astype(f32)   # (B,)
    coef_a = jnp.repeat(a_img, C).reshape(num_tiles, GC, 1)
    coef_s = jnp.repeat(s_img, C).reshape(num_tiles, GC, 1)

    # Per-image layer-1 bias (b1 + time embedding (+ class embedding)) -> per-tile column.
    bias = params["b1"][None, :] + params["time_emb"][tstep]
    if yclass is not None:
        bias = bias + params["class_emb"][yclass]
    bias_col = bias.astype(f32).reshape(num_tiles, GH, 1)

    # Block-diagonal weights (one dense matmul per layer per group).
    eye_g = jnp.eye(G, dtype=f32)
    w1_bd = jnp.kron(eye_g, params["w1"].astype(f32))                # (GH, GC)
    w2_bd = jnp.kron(eye_g, params["w2"].astype(f32))                # (GC, GH)
    b2_col = jnp.tile(params["b2"].astype(f32).reshape(C, 1), (G, 1))  # (GC, 1)

    # Augmented per-tile LHS: [bias | zeros(7) | block-diag w1]  (tiny vs image data).
    w1_aug = jnp.concatenate(
        [bias_col,
         jnp.zeros((num_tiles, GH, 7), f32),
         jnp.broadcast_to(w1_bd[None], (num_tiles, GH, GC))],
        axis=2)                                                      # (num_tiles, GH, 8+GC)

    partials = pl.pallas_call(
        _diffusion_loss_kernel,
        out_shape=jax.ShapeDtypeStruct((num_tiles, n_lane, 8, 128), f32),
        grid=(num_tiles, n_lane),
        in_specs=[
            pl.BlockSpec((1, GC, Pt), lambda i, p: (i, 0, p)),       # x      (f32)
            pl.BlockSpec((1, GC, Pt), lambda i, p: (i, 0, p)),       # noise  (f32)
            pl.BlockSpec((1, GC, 1), lambda i, p: (i, 0, 0)),        # sqrt(alphas_bar[t])
            pl.BlockSpec((1, GC, 1), lambda i, p: (i, 0, 0)),        # sqrt(1-alphas_bar[t])
            pl.BlockSpec((1, GH, 8 + GC), lambda i, p: (i, 0, 0)),   # bias col + block-diag w1
            pl.BlockSpec((GC, GH), lambda i, p: (0, 0)),             # block-diag w2 (resident)
            pl.BlockSpec((GC, 1), lambda i, p: (0, 0)),              # b2 (resident)
        ],
        out_specs=pl.BlockSpec((1, 1, 8, 128), lambda i, p: (i, p, 0, 0)),
        compiler_params=pltpu.CompilerParams(
            dimension_semantics=("parallel", "parallel"),            # no cross-step state
            vmem_limit_bytes=32 * 1024 * 1024),
    )(x3, n3, coef_a, coef_s, w1_aug, w2_bd, b2_col)

    # Final scalar reduction + 1/(B*C*H*W) mean scale (cheap wrapper glue).
    return jnp.sum(partials) * np.float32(1.0 / (B * C * P))


# ----------------------------------------------------------------------------
# Pure-jnp f32 reference mirroring the module numerics.
# ----------------------------------------------------------------------------
def diffusion_forward_reference(params, x, tstep, noise, yclass=None):
    B, C, H, W = x.shape
    P = H * W
    xf = x.reshape(B, C, P).astype(jnp.float32)
    nf = noise.reshape(B, C, P).astype(jnp.float32)
    a = params["sqrt_alphas_bar"][tstep].reshape(B, 1, 1)
    s = params["sqrt_one_minus_alphas_bar"][tstep].reshape(B, 1, 1)
    noisy = a * xf + s * nf
    bias = params["b1"][None, :] + params["time_emb"][tstep]
    if yclass is not None:
        bias = bias + params["class_emb"][yclass]
    h = jnp.einsum("hc,bcp->bhp", params["w1"], noisy,
                   precision=jax.lax.Precision.HIGHEST,
                   preferred_element_type=jnp.float32)
    h = jnp.maximum(h + bias[:, :, None], 0.0)
    pred = jnp.einsum("ch,bhp->bcp", params["w2"], h,
                      precision=jax.lax.Precision.HIGHEST,
                      preferred_element_type=jnp.float32) + params["b2"][None]
    diff = pred - nf
    return jnp.mean(diff * diff)


# ----------------------------------------------------------------------------
# Deterministic parameter / buffer construction (no checkpoint loading).
# ----------------------------------------------------------------------------
def make_params(num_timesteps, img_channels, hidden, num_classes, key):
    # diffusion schedule register_buffer equivalents
    betas = jnp.linspace(1e-4, 2e-2, num_timesteps, dtype=jnp.float32)
    alphas = 1.0 - betas
    alphas_bar = jnp.cumprod(alphas)

    k1, k2, k3, k4, k5, k6 = jax.random.split(key, 6)
    return {
        "betas": betas,
        "alphas": alphas,
        "alphas_bar": alphas_bar,
        "sqrt_alphas_bar": jnp.sqrt(alphas_bar),
        "sqrt_one_minus_alphas_bar": jnp.sqrt(1.0 - alphas_bar),
        "reciprocal_sqrt_alphas": jnp.sqrt(1.0 / alphas),
        "remove_noise_coeff": betas / jnp.sqrt(1.0 - alphas_bar),
        "sigma": jnp.sqrt(betas),
        # synthetic noise-prediction model weights (deterministic init)
        # TODO(synk): the reference module wraps an external UNet; a full UNet is
        # replaced here by a per-pixel 2-layer 1x1-conv MLP with time/class embeddings.
        "w1": 0.1 * jax.random.normal(k1, (hidden, img_channels), jnp.float32),
        "b1": 0.05 * jax.random.normal(k5, (hidden,), jnp.float32),
        "w2": 0.1 * jax.random.normal(k2, (img_channels, hidden), jnp.float32),
        "b2": 0.05 * jax.random.normal(k6, (img_channels, 1), jnp.float32),
        "time_emb": 0.1 * jax.random.normal(k3, (num_timesteps, hidden), jnp.float32),
        "class_emb": 0.1 * jax.random.normal(k4, (num_classes, hidden), jnp.float32),
    }


if __name__ == "__main__":
    B, C, H, W = 2, 4, 16, 16
    HIDDEN = 32
    NUM_TIMESTEPS = 10
    NUM_CLASSES = 5

    root = jax.random.PRNGKey(0)
    (k_param, k_x, k_t, k_noise, k_y,
     k2_x, k2_t, k2_noise, k2_y) = jax.random.split(root, 9)

    params = make_params(NUM_TIMESTEPS, C, HIDDEN, NUM_CLASSES, k_param)

    # forward(): tstep = randint(0, num_timesteps, (B,)); noise = randn_like(x)
    x = jax.random.normal(k_x, (B, C, H, W), jnp.float32)
    yclass = jax.random.randint(k_y, (B,), 0, NUM_CLASSES)
    tstep = jax.random.randint(k_t, (B,), 0, NUM_TIMESTEPS)
    noise = jax.random.normal(k_noise, (B, C, H, W), jnp.float32)

    loss = diffusion_forward(params, x, tstep, noise, yclass)
    ref = diffusion_forward_reference(params, x, tstep, noise, yclass)
    loss, ref = jax.block_until_ready((loss, ref))
    assert loss.shape == () and loss.dtype == jnp.float32
    assert bool(jnp.isfinite(loss))
    assert abs(float(loss) - float(ref)) <= 5e-3 * abs(float(ref)) + 5e-4, (loss, ref)

    # Larger batch: exercises group stacking (G=4 -> GC=16) and a multi-tile parallel grid.
    B2 = 8
    x_b = jax.random.normal(k2_x, (B2, C, H, W), jnp.float32)
    y_b = jax.random.randint(k2_y, (B2,), 0, NUM_CLASSES)
    t_b = jax.random.randint(k2_t, (B2,), 0, NUM_TIMESTEPS)
    n_b = jax.random.normal(k2_noise, (B2, C, H, W), jnp.float32)
    loss_b = diffusion_forward(params, x_b, t_b, n_b, y_b)
    ref_b = diffusion_forward_reference(params, x_b, t_b, n_b, y_b)
    loss_b, ref_b = jax.block_until_ready((loss_b, ref_b))
    assert bool(jnp.isfinite(loss_b))
    assert abs(float(loss_b) - float(ref_b)) <= 5e-3 * abs(float(ref_b)) + 5e-4, (loss_b, ref_b)

    print("KERNEL_OK")
</pallas_src>

<mosaic_0001>
module attributes {stable_mosaic.version = 11 : i64} {
  func.func @_diffusion_loss_kernel(%arg0: i32, %arg1: i32, %arg2: memref<1x8x128xf32, #tpu.memory_space<vmem>>, %arg3: memref<1x8x128xf32, #tpu.memory_space<vmem>>, %arg4: memref<1x8x1xf32, #tpu.memory_space<vmem>>, %arg5: memref<1x8x1xf32, #tpu.memory_space<vmem>>, %arg6: memref<1x64x16xf32, #tpu.memory_space<vmem>>, %arg7: memref<8x64xf32, #tpu.memory_space<vmem>>, %arg8: memref<8x1xf32, #tpu.memory_space<vmem>>, %arg9: memref<1x1x8x128xf32, #tpu.memory_space<vmem>>) attributes {dimension_semantics = [#tpu.dimension_semantics<parallel>, #tpu.dimension_semantics<parallel>], iteration_bounds = array<i64: 1, 2>, scalar_prefetch = 0 : i64, scratch_operands = 0 : i64, tpu.core_type = #tpu.core_type<tc>, window_params = [{transform_indices = @transform_0, window_bounds = array<i64: 1, 8, 128>}, {transform_indices = @transform_1, window_bounds = array<i64: 1, 8, 128>}, {transform_indices = @transform_2, window_bounds = array<i64: 1, 8, 1>}, {transform_indices = @transform_3, window_bounds = array<i64: 1, 8, 1>}, {transform_indices = @transform_4, window_bounds = array<i64: 1, 64, 16>}, {pipeline_mode = #tpu.pipeline_mode<synchronous>, transform_indices = @transform_5, window_bounds = array<i64: 8, 64>}, {pipeline_mode = #tpu.pipeline_mode<synchronous>, transform_indices = @transform_6, window_bounds = array<i64: 8, 1>}, {transform_indices = @transform_7, window_bounds = array<i64: 1, 1, 8, 128>}]} {
    %c0 = arith.constant 0 : index
    %c0_0 = arith.constant 0 : index
    %c0_1 = arith.constant 0 : index
    %0 = vector.load %arg2[%c0, %c0_0, %c0_1] : memref<1x8x128xf32, #tpu.memory_space<vmem>>, vector<1x8x128xf32>
    %1 = vector.shape_cast %0 : vector<1x8x128xf32> to vector<8x128xf32>
    %c0_2 = arith.constant 0 : index
    %c0_3 = arith.constant 0 : index
    %c0_4 = arith.constant 0 : index
    %2 = vector.load %arg3[%c0_2, %c0_3, %c0_4] : memref<1x8x128xf32, #tpu.memory_space<vmem>>, vector<1x8x128xf32>
    %3 = vector.shape_cast %2 : vector<1x8x128xf32> to vector<8x128xf32>
    %c0_5 = arith.constant 0 : index
    %c0_6 = arith.constant 0 : index
    %c0_7 = arith.constant 0 : index
    %4 = vector.load %arg4[%c0_5, %c0_6, %c0_7] : memref<1x8x1xf32, #tpu.memory_space<vmem>>, vector<1x8x1xf32>
    %5 = vector.shape_cast %4 : vector<1x8x1xf32> to vector<8x1xf32>
    %6 = vector.broadcast %5 : vector<8x1xf32> to vector<8x128xf32>
    %7 = arith.mulf %6, %1 : vector<8x128xf32>
    %c0_8 = arith.constant 0 : index
    %c0_9 = arith.constant 0 : index
    %c0_10 = arith.constant 0 : index
    %8 = vector.load %arg5[%c0_8, %c0_9, %c0_10] : memref<1x8x1xf32, #tpu.memory_space<vmem>>, vector<1x8x1xf32>
    %9 = vector.shape_cast %8 : vector<1x8x1xf32> to vector<8x1xf32>
    %10 = vector.broadcast %9 : vector<8x1xf32> to vector<8x128xf32>
    %11 = arith.mulf %10, %3 : vector<8x128xf32>
    %12 = arith.addf %7, %11 : vector<8x128xf32>
    %cst = arith.constant 1.000000e+00 : f32
    %13 = vector.broadcast %cst : f32 to vector<8x128xf32>
    %14 = tpu.concatenate %13, %12 in 0 : vector<8x128xf32>, vector<8x128xf32> -> vector<16x128xf32>
    %c0_11 = arith.constant 0 : index
    %c0_12 = arith.constant 0 : index
    %c0_13 = arith.constant 0 : index
    %15 = vector.load %arg6[%c0_11, %c0_12, %c0_13] : memref<1x64x16xf32, #tpu.memory_space<vmem>>, vector<1x64x16xf32>
    %16 = vector.shape_cast %15 : vector<1x64x16xf32> to vector<64x16xf32>
    %cst_14 = arith.constant dense<0.000000e+00> : vector<64x128xf32>
    %17 = tpu.matmul %16, %14, %cst_14 {dimension_numbers = #tpu.dot_dimension_numbers<[1], [0], [0], [1], [0, 0, 1, 1], [], []>} : vector<64x16xf32>, vector<16x128xf32>, vector<64x128xf32> -> vector<64x128xf32>
    %cst_15 = arith.constant 0.000000e+00 : f32
    %18 = vector.broadcast %cst_15 : f32 to vector<64x128xf32>
    %19 = arith.maximumf %17, %18 : vector<64x128xf32>
    %c0_16 = arith.constant 0 : index
    %c0_17 = arith.constant 0 : index
    %20 = vector.load %arg7[%c0_16, %c0_17] : memref<8x64xf32, #tpu.memory_space<vmem>>, vector<8x64xf32>
    %cst_18 = arith.constant dense<0.000000e+00> : vector<8x128xf32>
    %21 = tpu.matmul %20, %19, %cst_18 {dimension_numbers = #tpu.dot_dimension_numbers<[1], [0], [0], [1], [0, 0, 1, 1], [], []>} : vector<8x64xf32>, vector<64x128xf32>, vector<8x128xf32> -> vector<8x128xf32>
    %c0_19 = arith.constant 0 : index
    %c0_20 = arith.constant 0 : index
    %22 = vector.load %arg8[%c0_19, %c0_20] : memref<8x1xf32, #tpu.memory_space<vmem>>, vector<8x1xf32>
    %23 = vector.broadcast %22 : vector<8x1xf32> to vector<8x128xf32>
    %24 = arith.addf %21, %23 : vector<8x128xf32>
    %25 = arith.subf %24, %3 : vector<8x128xf32>
    %26 = arith.mulf %25, %25 : vector<8x128xf32>
    %27 = vector.shape_cast %26 : vector<8x128xf32> to vector<1x1x8x128xf32>
    %c0_21 = arith.constant 0 : index
    %c0_22 = arith.constant 0 : index
    %c0_23 = arith.constant 0 : index
    %c0_24 = arith.constant 0 : index
    %28 = vector.load %arg9[%c0_21, %c0_22, %c0_23, %c0_24] : memref<1x1x8x128xf32, #tpu.memory_space<vmem>>, vector<1x1x8x128xf32>
    tpu.vector_store %arg9[%c0_21, %c0_22, %c0_23, %c0_24], %27 {strides = array<i32>} : memref<1x1x8x128xf32, #tpu.memory_space<vmem>>, vector<1x1x8x128xf32>,
    return
  }
  func.func @transform_0(%arg0: i32, %arg1: i32) -> (i32, i32, i32) {
    %c0_i32 = arith.constant 0 : i32
    %c0_i32_0 = arith.constant 0 : i32
    return %arg0, %c0_i32, %arg1 : i32, i32, i32
  }
  func.func @transform_1(%arg0: i32, %arg1: i32) -> (i32, i32, i32) {
    %c0_i32 = arith.constant 0 : i32
    %c0_i32_0 = arith.constant 0 : i32
    return %arg0, %c0_i32, %arg1 : i32, i32, i32
  }
  func.func @transform_2(%arg0: i32, %arg1: i32) -> (i32, i32, i32) {
    %c0_i32 = arith.constant 0 : i32
    %c0_i32_0 = arith.constant 0 : i32
    %c0_i32_1 = arith.constant 0 : i32
    return %arg0, %c0_i32, %c0_i32_0 : i32, i32, i32
  }
  func.func @transform_3(%arg0: i32, %arg1: i32) -> (i32, i32, i32) {
    %c0_i32 = arith.constant 0 : i32
    %c0_i32_0 = arith.constant 0 : i32
    %c0_i32_1 = arith.constant 0 : i32
    return %arg0, %c0_i32, %c0_i32_0 : i32, i32, i32
  }
  func.func @transform_4(%arg0: i32, %arg1: i32) -> (i32, i32, i32) {
    %c0_i32 = arith.constant 0 : i32
    %c0_i32_0 = arith.constant 0 : i32
    %c0_i32_1 = arith.constant 0 : i32
    return %arg0, %c0_i32, %c0_i32_0 : i32, i32, i32
  }
  func.func @transform_5(%arg0: i32, %arg1: i32) -> (i32, i32) {
    %c0_i32 = arith.constant 0 : i32
    %c0_i32_0 = arith.constant 0 : i32
    %c0_i32_1 = arith.constant 0 : i32
    return %c0_i32, %c0_i32_0 : i32, i32
  }
  func.func @transform_6(%arg0: i32, %arg1: i32) -> (i32, i32) {
    %c0_i32 = arith.constant 0 : i32
    %c0_i32_0 = arith.constant 0 : i32
    %c0_i32_1 = arith.constant 0 : i32
    return %c0_i32, %c0_i32_0 : i32, i32
  }
  func.func @transform_7(%arg0: i32, %arg1: i32) -> (i32, i32, i32, i32) {
    %c0_i32 = arith.constant 0 : i32
    %c0_i32_0 = arith.constant 0 : i32
    %c0_i32_1 = arith.constant 0 : i32
    return %arg0, %arg1, %c0_i32, %c0_i32_0 : i32, i32, i32, i32
  }
}

</mosaic_0001>

<bundles_post_ra>
// kernel: tpu_custom_call.1
= control target key start
LH: loop header
LB: loop body
LE: loop exit
PB: predicated region body
PF: predicated region fallthrough
CT: control target
= control target key end

     0   :  { %12 = vsyncpa [#allocation3], 0  ;;  %s1233_s0 = inlined_call_operand.vmem [shape: f32[1,8,256], index: 0, kind: input, shape index: {}]   ;;  %s1234_s1 = inlined_call_operand.vmem [shape: f32[1,8,256], index: 1, kind: input, shape index: {}]   ;;  %s1235_s2 = inlined_call_operand.vmem [shape: f32[1,8,1], index: 2, kind: input, shape index: {}]   ;;  %s1236_s3 = inlined_call_operand.vmem [shape: f32[1,8,1], index: 3, kind: input, shape index: {}]   ;;  %s1237_s4 = inlined_call_operand.vmem [shape: f32[1,64,16], index: 4, kind: input, shape index: {}]   ;;  %s1238_s5 = inlined_call_operand.vmem [shape: f32[8,64], index: 5, kind: input, shape index: {}]   ;;  %s1239_s6 = inlined_call_operand.vmem [shape: f32[8,1], index: 6, kind: input, shape index: {}]   ;;  %s1240_s7 = inlined_call_operand.hbm [shape: f32[1,2,8,128], index: 7, kind: output, shape index: {}]  }
   0x1   :  { %14 = vsyncpa [#allocation3 + $0x1], 0  ;;  %s1070_s24 = smov 0   ;;  %s1072_s25 = smov 0  }
   0x2   :  { %s1074_s26 = smov 0   ;;  %s1076_s27 = smov 0  }
   0x3   :  { %s1078_s28 = smov 0   ;;  %s1080_s29 = smov 0  }
   0x4 LB: > { %s788_s30 = sadd.s32 4294967295, %s1022_s29   ;;  %s789_s8 = sadd.s32 4294967294, %s1022_s29   ;;  %s1022_s29 = sphi %s1080_s29, %s20_s29   ;;  %s1018_s28 = sphi %s1078_s28, %s1247_s28   ;;  %s1014_s27 = sphi %s1076_s27, %s1246_s27   ;;  %s1010_s26 = sphi %s1074_s26, %s1245_s26   ;;  %s1006_s25 = sphi %s1072_s25, %s1244_s25   ;;  %s1002_s24 = sphi %s1070_s24, %s1243_s24  }
   0x5   : > { %s29_s9 = sadd.s32 1, %s1018_s28  ;;  %s217_s10 = sadd.s32 1, %s1010_s26 }
   0x6   : > { %p30_p0 = scmp.ge.s32.totalorder %s29_s9, 2  ;;  %p227_p1 = scmp.ne.s32.totalorder %s1010_s26, %s1006_s25 }
   0x7   : > { %p228_p2 = scmp.eq.s32.totalorder %s788_s30, 1  ;;  %p233_p3 = scmp.ne.s32.totalorder %s1006_s25, %s1002_s24 }
   0x8   : > { %s1249_s9 = smov (%p30_p0, %s29_s9), 0  ;;  %p234_p5 = scmp.eq.s32.totalorder %s789_s8, 1 }
   0x9   : > { %p1110_p4 = por %p228_p2, %p227_p1  ;;  %s213_s12 = ssub.s32 %s1018_s28, %s1249_s9 }
   0xa   : > { %p795_p6 = scmp.ge.s32.totalorder %s1022_s29, 1  ;;  %p215_p7 = scmp.eq.s32.totalorder %s213_s12, 0 }
   0xb   : > { %p1117_p8 = por %p234_p5, %p233_p3  ;;  %p302_p9 = scmp.lt.s32.totalorder %s1022_s29, 3 }
   0xc   : > { %s1123_s14 = scalar_select %p215_p7, %s1010_s26, %s217_s10  }
   0xd   : > { %p303_p10 = pnand %p795_p6, %p302_p9 }
   0xe   : > { %v389_v0 = vld [vmem:[%s1235_s2] sm:$0xff] (!%p303_p10)  ;;  %v1024_v1 = vmov (!%p303_p10), 0   ;;  %vm412_vm0 = vcmask (!%p303_p10), 130048   ;;  %p360_p11 = scmp.lt.s32.totalorder (!%p303_p10), %s1014_s27, 1  ;;  %v1025_v11 = vmov (!%p303_p10), 1.0   ;;  %v405_v13 = vld [vmem:[%s1237_s4 + $0x8] sm:$0xff] (!%p303_p10) }
   0xf   : > { %306 = sbr.rel (%p303_p10) target bundleno = 622 (0x26e), region = 48  ;;  %942 = vset.pattern.permute.xlu0 (!%p303_p10), %v1024_v1  ;;  %943 = vset.pattern.permute.xlu1 (!%p303_p10), %v1024_v1  ;;  %v396_v2 = vld [vmem:[%s1236_s3] sm:$0xff] (!%p303_p10)  ;;  %v406_v14 = vld [vmem:[%s1237_s4 + $0x10] sm:$0xff] (!%p303_p10)  ;;  %v407_v15 = vld [vmem:[%s1237_s4 + $0x18] sm:$0xff] (!%p303_p10)  ;;  %v1026_v20 = vmov (!%p303_p10), 0.0|0.0   ;;  %vm1027_vm1 = vmmov (!%p303_p10), 0  }
  0x10   : > { %392 = vperm.xlu0 (!%p303_p10), %942, %v389_v0   ;;  %v404_v3 = vld [vmem:[%s1237_s4] sm:$0xff] (!%p303_p10)  ;;  %v409_v17 = vld [vmem:[%s1237_s4 + $0x28] sm:$0xff] (!%p303_p10)  ;;  %v410_v18 = vld [vmem:[%s1237_s4 + $0x30] sm:$0xff] (!%p303_p10)  ;;  %870 = vmatprep.subr.bf16.mxu1 (!%p303_p10), %v1026_v20  ;;  %v1028_v21 = vmov (!%p303_p10), 0.0   ;;  %vm557_vm2 = vcmask (!%p303_p10), 523264   ;;  %s809_s23 = sshll.u32 (!%p303_p10), %s1014_s27, 7 }
  0x11   : > { %835 = vmatprep.mubr.msk.f32.mxu0 (!%p303_p10), %vm412_vm0, %v404_v3  ;;  %v408_v16 = vld [vmem:[%s1237_s4 + $0x20] sm:$0xff] (!%p303_p10)  ;;  %v411_v19 = vld [vmem:[%s1237_s4 + $0x38] sm:$0xff] (!%p303_p10)  ;;  %863 = vmatprep.mubr.msk.f32.mxu1 (!%p303_p10), %vm1027_vm1, %v1028_v21 }
  0x12   : > { %v551_v22 = vld [vmem:[%s1239_s6] sm:$0xff] (!%p303_p10) }
  0x13   : > { %554 = vperm.xlu1 (!%p303_p10), %943, %v551_v22   ;;  %v550_v43 = vld [vmem:[%s1238_s5] sm:$0xff] (!%p303_p10) }
  0x14   : > { %399 = vperm.xlu0 (!%p303_p10), %942, %v396_v2  }
  0x16   : > { %s361_s21 = scalar_select %p360_p11, %s1014_s27, 1 }
  0x17   : > { %s1029_s27 = smov [#allocation2]  }
  0x18   : > { %s797_s22 = sshll.u32 %s361_s21, 3  ;;  %s355_s21 = sand.u32 1, %s1006_s25  }
  0x19   : > { %s365_s8 = scalar_lea.vmem %s1233_s0, %s797_s22  ;;  %s373_s15 = scalar_lea.vmem %s1234_s1, %s797_s22 }
  0x1a   : > { %v387_v5 = vld [vmem:[%s365_s8] sm:$0xff]  ;;  %s796_s22 = sshll.u32 %s355_s21, 3  ;;  %s635_s16 = scalar_lea.sflag [#allocation3], %s355_s21 }
  0x1b   : > { %v1143_v6 = vld [vmem:[%s373_s15] sm:$0xff]  ;;  %s357_s30 = scalar_lea.vmem [#allocation2], %s796_s22  ;;  %s1186_s15 = scalar_lea.hbm %s1240_s7, %s809_s23 }
  0x1c   : > { %s650_s8 = sshll.u32 %s357_s30, 4  ;;  %s948_s18 = sshll.u32 %s1029_s27, 4  ;;  %s1188_s8 = int_to_ptr.vmem [resolvable:$true] %s650_s8  ;;  %s949_s18 = int_to_ptr.vmem [resolvable:$false] %s948_s18 }
  0x1d   : > { %s944_s17 = scalar_lea.vmem %s1188_s8, 128  ;;  %s950_s19 = scalar_lea.vmem %s949_s18, 256 }
  0x1e   : > { %p945_p12 = scmp.ne.s32.totalorder %s1188_s8, %s944_s17  ;;  %p951_p1 = scmp.lt.s32.totalorder %s1188_s8, %s949_s18 }
  0x1f   : > { %p952_p2 = scmp.lt.s32.totalorder %s950_s19, %s944_s17 }
  0x20   : > { %p946_p13 = pnand %p945_p12, %p1110_p4 }
  0x21   : > { %p953_p3 = por %p952_p2, %p951_p1 }
  0x22   : > { %p947_p0 = pneg %p946_p13 }
  0x24   : > { %p954_p5 = pnand %p953_p3, %p947_p0 }
  0x8f   : > { %v393_v4 = vpop.permute.xlu0 %392 }
  0x90   : > { %v395_v8 = vmul.f32 %v393_v4, %v387_v5 }
  0x92   : > { %v555_v44 = vpop.permute.xlu1 %554 }
  0x93   : > { %v400_v7 = vpop.permute.xlu0 %399 }
  0x94   : > { %v402_v9 = vmul.f32 %v400_v7, %v1143_v6 }
  0x96   : > { %v403_v10 = vadd.f32 %v402_v9, %v395_v8 }
  0x98   : > { %v866_v12 = vpack.c.bf16 %v403_v10, %v1025_v11 }
  0x9a   : > { %867 = vmatprep.subr.bf16.mxu0 %v866_v12 }
  0x9b   : > { %869 = vmatpush3.bf16.msra.mxu0 %v866_v12 }
  0x9e   : > { %836 = vmatmul.mubr.msk.f32.vlgmr.msra.gmra.mrb[0].mxu0 %vm412_vm0, %v405_v13 }
  0x9f   : > { %838 = vmatprep.mubr.msk.f32.mxu0 %vm412_vm0, %v406_v14 }
  0xa2   : > { %839 = vmatmul.mubr.msk.f32.gmra.mrb[2].mxu0 %vm412_vm0, %v407_v15 }
  0xa3   : > { %841 = vmatprep.mubr.msk.f32.mxu0 %vm412_vm0, %v408_v16 }
  0xa6   : > { %842 = vmatmul.mubr.msk.f32.gmra.mrb[4].mxu0 %vm412_vm0, %v409_v17 }
  0xa7   : > { %844 = vmatprep.mubr.msk.f32.mxu0 %vm412_vm0, %v410_v18 }
  0xaa   : > { %845 = vmatmul.mubr.msk.f32.gmra.mrb[6].mxu0 %vm412_vm0, %v411_v19 }
 0x171   : > { %v837_v23 = vpop.f32.mrb[0].mxu0 }
 0x172   : > { %v543_v24 = vmax.f32 %v837_v23, 0.0  ;;  %v503_v25 = vpop.f32.mrb[1].mxu0 }
 0x173   : > { %v542_v26 = vmax.f32 %v503_v25, 0.0 }
 0x175   : > { %v840_v27 = vpop.f32.mrb[2].mxu0  ;;  %v871_v28 = vpack.c.bf16 %v543_v24, %v542_v26 }
 0x176   : > { %v545_v29 = vmax.f32 %v840_v27, 0.0  ;;  %v513_v30 = vpop.f32.mrb[3].mxu0 }
 0x177   : > { %v544_v31 = vmax.f32 %v513_v30, 0.0  ;;  %872 = vmatpush3.bf16.msra.mxu1 %v871_v28 }
 0x178   : > { %873 = vmatprep.subr.bf16.mxu1 %v1026_v20 }
 0x179   : > { %v874_v32 = vpack.c.bf16 %v545_v29, %v544_v31  ;;  %v843_v33 = vpop.f32.mrb[4].mxu0 }
 0x17a   : > { %v547_v34 = vmax.f32 %v843_v33, 0.0  ;;  %v523_v35 = vpop.f32.mrb[5].mxu0 }
 0x17b   : > { %v546_v36 = vmax.f32 %v523_v35, 0.0  ;;  %875 = vmatpush3.bf16.msra.mxu1 %v874_v32 }
 0x17c   : > { %876 = vmatprep.subr.bf16.mxu1 %v1026_v20 }
 0x17d   : > { %v877_v37 = vpack.c.bf16 %v547_v34, %v546_v36  ;;  %v846_v38 = vpop.f32.mrb[6].mxu0 }
 0x17e   : > { %v549_v39 = vmax.f32 %v846_v38, 0.0  ;;  %v533_v40 = vpop.f32.mrb[7].mxu0 }
 0x17f   : > { %v548_v41 = vmax.f32 %v533_v40, 0.0  ;;  %878 = vmatpush3.bf16.msra.mxu1 %v877_v37 }
 0x180   : > { %879 = vmatprep.subr.bf16.mxu1 %v1026_v20 }
 0x181   : > { %v880_v42 = vpack.c.bf16 %v549_v39, %v548_v41 }
 0x183   : > { %881 = vmatpush3.bf16.msra.mxu1 %v880_v42 }
 0x186   : > { %864 = vmatmul.mubr.msk.f32.vlgmr.msra.gmra.mrb[0].mxu1 %vm557_vm2, %v550_v43 }
 0x259   : > { %v627_v45 = vpop.f32.mrb[0].mxu1 }
 0x25a   : > { %v628_v46 = vadd.f32 %v627_v45, %v555_v44  ;;  %v865_v47 = vpop.f32.mrb[1].mxu1 }
 0x25c   : > { %v631_v48 = vsub.f32 %v628_v46, %v1143_v6 }
 0x25e   : > { %v632_v49 = vmul.f32 %v631_v48, %v631_v48 }
 0x260   : > { %633 = vst [vmem:[%s357_s30] sm:$0xff] %v632_v49 }
 0x261   : > { %957 = shalt.err (!%p954_p5)
}
 0x262   : > { %s958_s20 = scalar_lea.hbm %s1186_s15, 128  ;;  %s962_s23 = scalar_lea.hbm %s1240_s7, 256 }
 0x263   : > { %p959_p6 = scmp.ne.s32.totalorder %s1186_s15, %s958_s20  ;;  %p963_p10 = scmp.lt.u32.totalorder %s1186_s15, %s1240_s7 }
 0x264   : > { %p964_p11 = scmp.lt.u32.totalorder %s962_s23, %s958_s20  ;;  %p966_p13 = scmp.lt.u32.totalorder %s958_s20, %s1186_s15 }
 0x265   : > { %p960_p7 = pnand %p959_p6, %p1110_p4 }
 0x266   : > { %p965_p12 = por %p964_p11, %p963_p10 }
 0x267   : > { %p961_p9 = pneg %p960_p7 }
 0x268   : > { %p967_p0 = por %p966_p13, %p965_p12 }
 0x26a   : > { %p968_p1 = pnand %p967_p0, %p961_p9 }
 0x26c   : > { %971 = shalt.err (!%p968_p1)
}
 0x26d   : > { %882 = dma.vmem_to_hbm [thread:$0]  (%p1110_p4), %s1188_s8, 128, %s1186_s15, %s635_s16  }
 0x26e PF: > { %p888_p2 = scmp.ge.s32.totalorder %s1022_s29, 2  ;;  %s662_s12 = sand.u32 1, %s1002_s24  }
 0x26f   : > { %s663_s17 = scalar_lea.sflag [#allocation3], %s662_s12 }
 0x270   : > { %p885_p3 = pnand %p888_p2, %p1117_p8 }
 0x272   : > { %997 = dma.done.wait (!%p885_p3), %s663_s17, 128  }
 0x273   : > { %999 = vsyncadd (!%p885_p3), %s663_s17, 4294967168  ;;  %s20_s29 = sadd.s32 1, %s1022_s29   ;;  %s1243_s24 = smov %s1006_s25 }
 0x274   : > { %p17_p5 = scmp.ge.s32.totalorder %s20_s29, 4   ;;  %s1244_s25 = smov %s1010_s26 }
 0x275   : > { %s1245_s26 = smov %s1123_s14  ;;  %s1246_s27 = smov %s1018_s28 }
 0x276   : > { %s1247_s28 = smov %s1249_s9  ;;  %19 = sbr.rel (!%p17_p5) target bundleno = 4 (0x4), region = 95 }
 0x27d   :  { %668 = vsyncpa [#allocation3], 1 }
 0x27e   :  { %670 = vsyncpa [#allocation3 + $0x1], 1 }

</bundles_post_ra>
